<compile_context>
chip_gen: v7x
topology: tpu7x:2x2x1
jax: 0.10.0
libtpu: 0.0.40
codegen_flags: <defaults>
</compile_context>

<pallas_src>
import functools

import jax
import jax.numpy as jnp
from jax import lax
from jax.experimental import pallas as pl
from jax.experimental.pallas import tpu as pltpu

_LANE = 128
_SUBLANE = 8


def _round_up(x, m):
    return (x + m - 1) // m * m


def _multi_mlp_kernel(n_layers, compute_dtype, x_ref, w_ref, b_ref, o_ref):
    """Fused forward for n_layers MLP blocks.

    x_ref : (TM, D_pad)            activation tile (f32)
    w_ref : (2*n_layers, D_pad, D_pad)  stacked [fc1, fc2] weights, (out, in) layout
    b_ref : (2*n_layers, 1, D_pad)      stacked biases (f32)
    o_ref : (TM, D_pad)            output tile
    """
    dn = (((1,), (1,)), ((), ()))  # contract x[-1] with w[-1]  ==  x @ w.T
    x = x_ref[...]                 # f32 activations

    for i in range(n_layers):      # static Python unroll (n_layers is compile-time)
        w1 = w_ref[2 * i]
        b1 = b_ref[2 * i]
        w2 = w_ref[2 * i + 1]
        b2 = b_ref[2 * i + 1]

        h = lax.dot_general(x.astype(compute_dtype), w1, dn,
                            preferred_element_type=jnp.float32) + b1
        h = jnp.maximum(h, 0.0)    # element-wise stays in f32 (v5e-friendly)
        x = lax.dot_general(h.astype(compute_dtype), w2, dn,
                            preferred_element_type=jnp.float32) + b2

    o_ref[...] = x.astype(o_ref.dtype)


def multi_mlp_forward(x, layer_params, *, compute_dtype=jnp.float32, block_rows=256):
    """Run MultiMLPWithDw.forward as one Pallas call.

    x: (batch, d_hid) float32
    layer_params: list (length n_layers) of dicts with keys
      fc1_weight (d_hid, d_hid), fc1_bias (d_hid,), fc2_weight, fc2_bias.
    compute_dtype: dtype fed to the MXU (jnp.float32 or jnp.bfloat16).
    """
    n_layers = len(layer_params)
    batch, d_hid = x.shape

    # Lane-dense / sublane-aligned padding, done once in the wrapper.
    d_pad = _round_up(d_hid, _LANE)
    tm = min(block_rows, _round_up(batch, _SUBLANE))
    tm = _round_up(tm, _SUBLANE)
    bp = _round_up(batch, tm)

    x_pad = jnp.zeros((bp, d_pad), jnp.float32).at[:batch, :d_hid].set(x)

    # Stack all layer weights / biases into single resident operands.
    w_stack = jnp.zeros((2 * n_layers, d_pad, d_pad), jnp.float32)
    b_stack = jnp.zeros((2 * n_layers, 1, d_pad), jnp.float32)
    for li, p in enumerate(layer_params):
        w_stack = w_stack.at[2 * li, :d_hid, :d_hid].set(p["fc1_weight"])
        w_stack = w_stack.at[2 * li + 1, :d_hid, :d_hid].set(p["fc2_weight"])
        b_stack = b_stack.at[2 * li, 0, :d_hid].set(p["fc1_bias"])
        b_stack = b_stack.at[2 * li + 1, 0, :d_hid].set(p["fc2_bias"])
    w_stack = w_stack.astype(compute_dtype)   # cast once, wrapper-side

    in_specs = [
        pl.BlockSpec((tm, d_pad), lambda i: (i, 0)),                      # pipelined x tile
        pl.BlockSpec((2 * n_layers, d_pad, d_pad), lambda i: (0, 0, 0)),  # resident weights
        pl.BlockSpec((2 * n_layers, 1, d_pad), lambda i: (0, 0, 0)),      # resident biases
    ]
    out_spec = pl.BlockSpec((tm, d_pad), lambda i: (i, 0))

    # VMEM budget: double-buffered resident weights/biases + pipelined x/out
    # tiles + intermediate activations, capped at 64 MiB (legal on v7x).
    w_bytes = 2 * 2 * n_layers * d_pad * d_pad * jnp.dtype(compute_dtype).itemsize
    b_bytes = 2 * 2 * n_layers * d_pad * 4
    io_bytes = 2 * 2 * tm * d_pad * 4
    act_bytes = 8 * tm * d_pad * 4
    vmem_limit = int(min(max(w_bytes + b_bytes + io_bytes + act_bytes + (4 << 20),
                             16 << 20), 64 << 20))

    kernel = functools.partial(_multi_mlp_kernel, n_layers, compute_dtype)
    out = pl.pallas_call(
        kernel,
        out_shape=jax.ShapeDtypeStruct((bp, d_pad), jnp.float32),
        grid=(bp // tm,),
        in_specs=in_specs,
        out_specs=out_spec,
        compiler_params=pltpu.CompilerParams(
            dimension_semantics=("parallel",),
            vmem_limit_bytes=vmem_limit,
        ),
    )(x_pad, w_stack, b_stack)
    return out[:batch, :d_hid]


def make_params(key, d_hid, n_layers):
    """Synthetic parameters matching MLPModuleWithDw.__init__ (uniform_(-0.01, 0.01))."""
    layers = []
    for k in jax.random.split(key, n_layers):
        k1, k2, k3, k4 = jax.random.split(k, 4)
        layers.append({
            "fc1_weight": jax.random.uniform(k1, (d_hid, d_hid), jnp.float32, -0.01, 0.01),
            "fc1_bias":   jax.random.uniform(k2, (d_hid,),       jnp.float32, -0.01, 0.01),
            "fc2_weight": jax.random.uniform(k3, (d_hid, d_hid), jnp.float32, -0.01, 0.01),
            "fc2_bias":   jax.random.uniform(k4, (d_hid,),       jnp.float32, -0.01, 0.01),
        })
    return layers


def _reference_forward(x, layers):
    """Pure-JAX reference mirroring MultiMLPWithDw.forward."""
    for p in layers:
        x = jnp.maximum(x @ p["fc1_weight"].T + p["fc1_bias"], 0.0)
        x = x @ p["fc2_weight"].T + p["fc2_bias"]
    return x


if __name__ == "__main__":
    d_hid = 32
    batch = 8
    n_layers = 2

    key = jax.random.PRNGKey(0)
    kx, kp = jax.random.split(key)
    x = jax.random.normal(kx, (batch, d_hid), jnp.float32)
    layers = make_params(kp, d_hid, n_layers)

    ref = _reference_forward(x, layers)

    # f32 MXU path.
    out_f32 = jax.block_until_ready(
        multi_mlp_forward(x, layers, compute_dtype=jnp.float32))
    assert out_f32.shape == (batch, d_hid)
    assert jnp.allclose(out_f32, ref, atol=1e-4, rtol=1e-2), "f32 mismatch vs reference"

    # bf16 MXU path (weights cast once in the wrapper, f32 accumulation).
    out_bf16 = jax.block_until_ready(
        multi_mlp_forward(x, layers, compute_dtype=jnp.bfloat16))
    assert out_bf16.shape == (batch, d_hid)
    assert jnp.allclose(out_bf16, ref, atol=1e-3, rtol=5e-2), "bf16 mismatch vs reference"

    print("KERNEL_OK")
</pallas_src>

<mosaic_0001>
module attributes {stable_mosaic.version = 11 : i64} {
  func.func @_multi_mlp_kernel(%arg0: i32, %arg1: memref<8x128xf32, #tpu.memory_space<vmem>>, %arg2: memref<4x128x128xf32, #tpu.memory_space<vmem>>, %arg3: memref<4x1x128xf32, #tpu.memory_space<vmem>>, %arg4: memref<8x128xf32, #tpu.memory_space<vmem>>) attributes {dimension_semantics = [#tpu.dimension_semantics<parallel>], iteration_bounds = array<i64: 1>, scalar_prefetch = 0 : i64, scratch_operands = 0 : i64, tpu.core_type = #tpu.core_type<tc>, window_params = [{transform_indices = @transform_0, window_bounds = array<i64: 8, 128>}, {pipeline_mode = #tpu.pipeline_mode<synchronous>, transform_indices = @transform_1, window_bounds = array<i64: 4, 128, 128>}, {pipeline_mode = #tpu.pipeline_mode<synchronous>, transform_indices = @transform_2, window_bounds = array<i64: 4, 1, 128>}, {transform_indices = @transform_3, window_bounds = array<i64: 8, 128>}]} {
    %c0 = arith.constant 0 : index
    %c0_0 = arith.constant 0 : index
    %0 = vector.load %arg1[%c0, %c0_0] : memref<8x128xf32, #tpu.memory_space<vmem>>, vector<8x128xf32>
    %c0_1 = arith.constant 0 : index
    %c0_2 = arith.constant 0 : index
    %c0_3 = arith.constant 0 : index
    %1 = vector.load %arg2[%c0_1, %c0_2, %c0_3] : memref<4x128x128xf32, #tpu.memory_space<vmem>>, vector<1x128x128xf32>
    %2 = vector.shape_cast %1 : vector<1x128x128xf32> to vector<128x128xf32>
    %c0_4 = arith.constant 0 : index
    %c0_5 = arith.constant 0 : index
    %c0_6 = arith.constant 0 : index
    %3 = vector.load %arg3[%c0_4, %c0_5, %c0_6] : memref<4x1x128xf32, #tpu.memory_space<vmem>>, vector<1x1x128xf32>
    %4 = vector.shape_cast %3 : vector<1x1x128xf32> to vector<1x128xf32>
    %c1 = arith.constant 1 : index
    %c0_7 = arith.constant 0 : index
    %c0_8 = arith.constant 0 : index
    %5 = vector.load %arg2[%c1, %c0_7, %c0_8] : memref<4x128x128xf32, #tpu.memory_space<vmem>>, vector<1x128x128xf32>
    %6 = vector.shape_cast %5 : vector<1x128x128xf32> to vector<128x128xf32>
    %c1_9 = arith.constant 1 : index
    %c0_10 = arith.constant 0 : index
    %c0_11 = arith.constant 0 : index
    %7 = vector.load %arg3[%c1_9, %c0_10, %c0_11] : memref<4x1x128xf32, #tpu.memory_space<vmem>>, vector<1x1x128xf32>
    %8 = vector.shape_cast %7 : vector<1x1x128xf32> to vector<1x128xf32>
    %cst = arith.constant dense<0.000000e+00> : vector<8x128xf32>
    %9 = tpu.matmul %0, %2, %cst {dimension_numbers = #tpu.dot_dimension_numbers<[1], [1], [0], [0], [0, 0, 1, 0], [], []>} : vector<8x128xf32>, vector<128x128xf32>, vector<8x128xf32> -> vector<8x128xf32>
    %10 = vector.broadcast %4 : vector<1x128xf32> to vector<8x128xf32>
    %11 = arith.addf %9, %10 : vector<8x128xf32>
    %cst_12 = arith.constant 0.000000e+00 : f32
    %12 = vector.broadcast %cst_12 : f32 to vector<8x128xf32>
    %13 = arith.maximumf %11, %12 : vector<8x128xf32>
    %cst_13 = arith.constant dense<0.000000e+00> : vector<8x128xf32>
    %14 = tpu.matmul %13, %6, %cst_13 {dimension_numbers = #tpu.dot_dimension_numbers<[1], [1], [0], [0], [0, 0, 1, 0], [], []>} : vector<8x128xf32>, vector<128x128xf32>, vector<8x128xf32> -> vector<8x128xf32>
    %15 = vector.broadcast %8 : vector<1x128xf32> to vector<8x128xf32>
    %16 = arith.addf %14, %15 : vector<8x128xf32>
    %c2 = arith.constant 2 : index
    %c0_14 = arith.constant 0 : index
    %c0_15 = arith.constant 0 : index
    %17 = vector.load %arg2[%c2, %c0_14, %c0_15] : memref<4x128x128xf32, #tpu.memory_space<vmem>>, vector<1x128x128xf32>
    %18 = vector.shape_cast %17 : vector<1x128x128xf32> to vector<128x128xf32>
    %c2_16 = arith.constant 2 : index
    %c0_17 = arith.constant 0 : index
    %c0_18 = arith.constant 0 : index
    %19 = vector.load %arg3[%c2_16, %c0_17, %c0_18] : memref<4x1x128xf32, #tpu.memory_space<vmem>>, vector<1x1x128xf32>
    %20 = vector.shape_cast %19 : vector<1x1x128xf32> to vector<1x128xf32>
    %c3 = arith.constant 3 : index
    %c0_19 = arith.constant 0 : index
    %c0_20 = arith.constant 0 : index
    %21 = vector.load %arg2[%c3, %c0_19, %c0_20] : memref<4x128x128xf32, #tpu.memory_space<vmem>>, vector<1x128x128xf32>
    %22 = vector.shape_cast %21 : vector<1x128x128xf32> to vector<128x128xf32>
    %c3_21 = arith.constant 3 : index
    %c0_22 = arith.constant 0 : index
    %c0_23 = arith.constant 0 : index
    %23 = vector.load %arg3[%c3_21, %c0_22, %c0_23] : memref<4x1x128xf32, #tpu.memory_space<vmem>>, vector<1x1x128xf32>
    %24 = vector.shape_cast %23 : vector<1x1x128xf32> to vector<1x128xf32>
    %cst_24 = arith.constant dense<0.000000e+00> : vector<8x128xf32>
    %25 = tpu.matmul %16, %18, %cst_24 {dimension_numbers = #tpu.dot_dimension_numbers<[1], [1], [0], [0], [0, 0, 1, 0], [], []>} : vector<8x128xf32>, vector<128x128xf32>, vector<8x128xf32> -> vector<8x128xf32>
    %26 = vector.broadcast %20 : vector<1x128xf32> to vector<8x128xf32>
    %27 = arith.addf %25, %26 : vector<8x128xf32>
    %cst_25 = arith.constant 0.000000e+00 : f32
    %28 = vector.broadcast %cst_25 : f32 to vector<8x128xf32>
    %29 = arith.maximumf %27, %28 : vector<8x128xf32>
    %cst_26 = arith.constant dense<0.000000e+00> : vector<8x128xf32>
    %30 = tpu.matmul %29, %22, %cst_26 {dimension_numbers = #tpu.dot_dimension_numbers<[1], [1], [0], [0], [0, 0, 1, 0], [], []>} : vector<8x128xf32>, vector<128x128xf32>, vector<8x128xf32> -> vector<8x128xf32>
    %31 = vector.broadcast %24 : vector<1x128xf32> to vector<8x128xf32>
    %32 = arith.addf %30, %31 : vector<8x128xf32>
    %c0_27 = arith.constant 0 : index
    %c0_28 = arith.constant 0 : index
    %33 = vector.load %arg4[%c0_27, %c0_28] : memref<8x128xf32, #tpu.memory_space<vmem>>, vector<8x128xf32>
    tpu.vector_store %arg4[%c0_27, %c0_28], %32 {strides = array<i32>} : memref<8x128xf32, #tpu.memory_space<vmem>>, vector<8x128xf32>,
    return
  }
  func.func @transform_0(%arg0: i32) -> (i32, i32) {
    %c0_i32 = arith.constant 0 : i32
    %c0_i32_0 = arith.constant 0 : i32
    return %arg0, %c0_i32 : i32, i32
  }
  func.func @transform_1(%arg0: i32) -> (i32, i32, i32) {
    %c0_i32 = arith.constant 0 : i32
    %c0_i32_0 = arith.constant 0 : i32
    %c0_i32_1 = arith.constant 0 : i32
    %c0_i32_2 = arith.constant 0 : i32
    return %c0_i32, %c0_i32_0, %c0_i32_1 : i32, i32, i32
  }
  func.func @transform_2(%arg0: i32) -> (i32, i32, i32) {
    %c0_i32 = arith.constant 0 : i32
    %c0_i32_0 = arith.constant 0 : i32
    %c0_i32_1 = arith.constant 0 : i32
    %c0_i32_2 = arith.constant 0 : i32
    return %c0_i32, %c0_i32_0, %c0_i32_1 : i32, i32, i32
  }
  func.func @transform_3(%arg0: i32) -> (i32, i32) {
    %c0_i32 = arith.constant 0 : i32
    %c0_i32_0 = arith.constant 0 : i32
    return %arg0, %c0_i32 : i32, i32
  }
}

</mosaic_0001>

<bundles_post_ra>
// kernel: tpu_custom_call.1
= control target key start
LH: loop header
LB: loop body
LE: loop exit
PB: predicated region body
PF: predicated region fallthrough
CT: control target
= control target key end

     0   :  { %8 = vsyncpa [#allocation3], 0  ;;  %s953_s0 = inlined_call_operand.hbm [shape: f32[8,128], index: 0, kind: input, shape index: {}]   ;;  %s954_s1 = inlined_call_operand.hbm [shape: f32[4,128,128], index: 1, kind: input, shape index: {}]   ;;  %s955_s2 = inlined_call_operand.vmem [shape: f32[4,1,128], index: 2, kind: input, shape index: {}]   ;;  %s956_s3 = inlined_call_operand.hbm [shape: f32[8,128], index: 3, kind: output, shape index: {}]  }
   0x1   :  { %9 = vsyncpa [#allocation6], 0 }
   0x2   :  { %10 = vsyncpa [#allocation4], 0  ;;  %s830_s12 = smov [#allocation2]   ;;  %s831_s14 = smov [#allocation5]  }
   0x3   :  { %s17_s13 = sshll.u32 %s830_s12, 4  ;;  %s26_s15 = sshll.u32 %s831_s14, 4  ;;  %s18_s13 = int_to_ptr.vmem [resolvable:$true] %s17_s13  ;;  %s858_s15 = int_to_ptr.vmem [resolvable:$true] %s26_s15 }
   0x4   :  { %s758_s18 = scalar_lea.hbm %s953_s0, 128 }
   0x5   :  { %p759_p0 = scmp.ne.s32.totalorder %s953_s0, %s758_s18  ;;  %p762_p1 = scmp.lt.u32.totalorder %s758_s18, %s953_s0 }
   0x7   :  { %p764_p2 = pnand %p762_p1, %p759_p0 }
   0x9   :  { %767 = shalt.err (!%p764_p2)
}
   0xa   :  { %s768_s23 = scalar_lea.vmem %s18_s13, 128  ;;  %p773_p4 = scmp.lt.s32.totalorder %s18_s13, %s18_s13 }
   0xb   :  { %p769_p3 = scmp.ne.s32.totalorder %s18_s13, %s768_s23  ;;  %p774_p5 = scmp.lt.s32.totalorder %s768_s23, %s768_s23 }
   0xd   :  { %p775_p6 = por %p774_p5, %p773_p4 }
   0xf   :  { %p776_p7 = pnand %p775_p6, %p769_p3 }
  0x11   :  { %779 = shalt.err (!%p776_p7)
}
  0x12   :  { %20 = dma.hbm_to_vmem [thread:$0]  %s953_s0, 128, %s18_s13, [#allocation3]  }
  0x13   :  { %s780_s28 = scalar_lea.hbm %s954_s1, 8192 }
  0x14   :  { %p781_p8 = scmp.ne.s32.totalorder %s954_s1, %s780_s28  ;;  %p784_p9 = scmp.lt.u32.totalorder %s780_s28, %s954_s1 }
  0x16   :  { %p786_p10 = pnand %p784_p9, %p781_p8 }
  0x18   :  { %789 = shalt.err (!%p786_p10)
}
  0x19   :  { %s790_s6 = scalar_lea.vmem %s858_s15, 8192  ;;  %p795_p12 = scmp.lt.s32.totalorder %s858_s15, %s858_s15 }
  0x1a   :  { %p791_p11 = scmp.ne.s32.totalorder %s858_s15, %s790_s6  ;;  %p796_p13 = scmp.lt.s32.totalorder %s790_s6, %s790_s6 }
  0x1c   :  { %p797_p0 = por %p796_p13, %p795_p12 }
  0x1e   :  { %p798_p1 = pnand %p797_p0, %p791_p11 }
  0x20   :  { %801 = shalt.err (!%p798_p1)
}
  0x21   :  { %s832_s0 = smov 128   ;;  %s833_s7 = smov 8  }
  0x22   :  { %32 = dma.hbm_to_vmem [thread:$0]  %s954_s1, 8192, %s858_s15, [#allocation6], %s832_s0, %s832_s0, %s833_s7  }
  0x23   :  { %824 = dma.done.wait [#allocation3], 128  }
  0x24   :  { %825 = vsyncadd [#allocation3], 4294967168 }
  0x25   :  { %826 = dma.done.wait [#allocation6], 8192  }
  0x26   :  { %827 = vsyncadd [#allocation6], 4294959104  ;;  %v834_v0 = vmov 0.0|0.0   ;;  %vm835_vm0 = vmmov 0   ;;  %v836_v1 = vmov 0.0   ;;  %v42_v2 = vld [vmem:[#allocation5] sm:$0xff] }
  0x27   :  { %654 = vmatprep.subr.bf16.mxu0 %v834_v0  ;;  %546 = vmatprep.mubr.msk.f32.mxu0 %vm835_vm0, %v836_v1  ;;  %v43_v3 = vld [vmem:[#allocation5 + $0x8] sm:$0xff]  ;;  %v44_v5 = vld [vmem:[#allocation5 + $0x10] sm:$0xff]  ;;  %v45_v6 = vld [vmem:[#allocation5 + $0x18] sm:$0xff]  ;;  %s837_s17 = smov [#allocation7]  }
  0x28   :  { %678 = vmatprep.subr.bf16.mxu1 %v834_v0  ;;  %581 = vmatprep.mubr.msk.f32.mxu1 %vm835_vm0, %v836_v1  ;;  %v655_v4 = vpack.c.bf16 %v43_v3, %v42_v2  ;;  %v60_v7 = vld [vmem:[#allocation5 + $0x80] sm:$0xff]  ;;  %v61_v8 = vld [vmem:[#allocation5 + $0x88] sm:$0xff]  ;;  %v658_v9 = vpack.c.bf16 %v45_v6, %v44_v5  ;;  %v62_v11 = vld [vmem:[#allocation5 + $0x90] sm:$0xff]  ;;  %s429_s18 = sshll.u32 %s837_s17, 4  ;;  %s430_s18 = int_to_ptr.vmem [resolvable:$true] %s429_s18 }
  0x29   :  { %v679_v10 = vpack.c.bf16 %v61_v8, %v60_v7  ;;  %v63_v12 = vld [vmem:[#allocation5 + $0x98] sm:$0xff]  ;;  %v46_v13 = vld [vmem:[#allocation5 + $0x20] sm:$0xff]  ;;  %v47_v14 = vld [vmem:[#allocation5 + $0x28] sm:$0xff]  ;;  %s802_s19 = scalar_lea.vmem %s430_s18, 128  ;;  %p807_p3 = scmp.lt.s32.totalorder %s430_s18, %s430_s18 }
  0x2a   :  { %656 = vmatpush3.bf16.xpose.msra.mxu0 %v655_v4  ;;  %v682_v15 = vpack.c.bf16 %v63_v12, %v62_v11  ;;  %v661_v16 = vpack.c.bf16 %v47_v14, %v46_v13  ;;  %v64_v17 = vld [vmem:[#allocation5 + $0xa0] sm:$0xff]  ;;  %v65_v18 = vld [vmem:[#allocation5 + $0xa8] sm:$0xff]  ;;  %v48_v19 = vld [vmem:[#allocation5 + $0x30] sm:$0xff]  ;;  %p803_p2 = scmp.ne.s32.totalorder %s430_s18, %s802_s19  ;;  %p808_p4 = scmp.lt.s32.totalorder %s802_s19, %s802_s19 }
  0x2b   :  { %657 = vmatprep.subr.bf16.mxu0 %v834_v0  ;;  %680 = vmatpush3.bf16.xpose.msra.mxu1 %v679_v10  ;;  %v49_v20 = vld [vmem:[#allocation5 + $0x38] sm:$0xff]  ;;  %v685_v21 = vpack.c.bf16 %v65_v18, %v64_v17  ;;  %v66_v23 = vld [vmem:[#allocation5 + $0xb0] sm:$0xff]  ;;  %v50_v25 = vld [vmem:[#allocation5 + $0x40] sm:$0xff] }
  0x2c   :  { %681 = vmatprep.subr.bf16.mxu1 %v834_v0  ;;  %v664_v22 = vpack.c.bf16 %v49_v20, %v48_v19  ;;  %v67_v24 = vld [vmem:[#allocation5 + $0xb8] sm:$0xff]  ;;  %v51_v26 = vld [vmem:[#allocation5 + $0x48] sm:$0xff]  ;;  %v68_v29 = vld [vmem:[#allocation5 + $0xc0] sm:$0xff]  ;;  %p809_p5 = por %p808_p4, %p807_p3 }
  0x2d   :  { %v688_v27 = vpack.c.bf16 %v67_v24, %v66_v23  ;;  %v667_v28 = vpack.c.bf16 %v51_v26, %v50_v25  ;;  %v69_v30 = vld [vmem:[#allocation5 + $0xc8] sm:$0xff]  ;;  %v52_v31 = vld [vmem:[#allocation5 + $0x50] sm:$0xff]  ;;  %v53_v32 = vld [vmem:[#allocation5 + $0x58] sm:$0xff] }
  0x2e   :  { %v691_v33 = vpack.c.bf16 %v69_v30, %v68_v29  ;;  %v670_v34 = vpack.c.bf16 %v53_v32, %v52_v31  ;;  %v70_v35 = vld [vmem:[#allocation5 + $0xd0] sm:$0xff]  ;;  %v71_v36 = vld [vmem:[#allocation5 + $0xd8] sm:$0xff]  ;;  %v54_v37 = vld [vmem:[#allocation5 + $0x60] sm:$0xff]  ;;  %p810_p6 = pnand %p809_p5, %p803_p2 }
  0x2f   :  { %v55_v38 = vld [vmem:[#allocation5 + $0x68] sm:$0xff]  ;;  %v694_v39 = vpack.c.bf16 %v71_v36, %v70_v35  ;;  %v72_v41 = vld [vmem:[#allocation5 + $0xe0] sm:$0xff]  ;;  %v56_v43 = vld [vmem:[#allocation5 + $0x70] sm:$0xff] }
  0x30   :  { %v673_v40 = vpack.c.bf16 %v55_v38, %v54_v37  ;;  %v73_v42 = vld [vmem:[#allocation5 + $0xe8] sm:$0xff]  ;;  %v57_v44 = vld [vmem:[#allocation5 + $0x78] sm:$0xff]  ;;  %v74_v47 = vld [vmem:[#allocation5 + $0xf0] sm:$0xff] }
  0x31   :  { %v697_v45 = vpack.c.bf16 %v73_v42, %v72_v41  ;;  %v676_v46 = vpack.c.bf16 %v57_v44, %v56_v43  ;;  %v75_v48 = vld [vmem:[#allocation5 + $0xf8] sm:$0xff]  ;;  %v232_v51 = vld [vmem:[#allocation5 + $0x100] sm:$0xff]  ;;  %v233_v52 = vld [vmem:[#allocation5 + $0x108] sm:$0xff] }
  0x32   :  { %659 = vmatpush3.bf16.xpose.msra.mxu0 %v658_v9  ;;  %v700_v49 = vpack.c.bf16 %v75_v48, %v74_v47  ;;  %v41_v50 = vld [vmem:[#allocation2] sm:$0xff]  ;;  %v703_v53 = vpack.c.bf16 %v233_v52, %v232_v51  ;;  %v234_v54 = vld [vmem:[#allocation5 + $0x110] sm:$0xff]  ;;  %v236_v57 = vld [vmem:[#allocation5 + $0x120] sm:$0xff] }
  0x33   :  { %660 = vmatprep.subr.bf16.mxu0 %v834_v0  ;;  %683 = vmatpush3.bf16.xpose.msra.mxu1 %v682_v15  ;;  %v235_v55 = vld [vmem:[#allocation5 + $0x118] sm:$0xff]  ;;  %v237_v58 = vld [vmem:[#allocation5 + $0x128] sm:$0xff]  ;;  %v238_v60 = vld [vmem:[#allocation5 + $0x130] sm:$0xff] }
  0x34   :  { %684 = vmatprep.subr.bf16.mxu1 %v834_v0  ;;  %v706_v56 = vpack.c.bf16 %v235_v55, %v234_v54  ;;  %v709_v59 = vpack.c.bf16 %v237_v58, %v236_v57  ;;  %v239_v61 = vld [vmem:[#allocation5 + $0x138] sm:$0xff]  ;;  %v240_v63 = vld [vmem:[#allocation5 + $0x140] sm:$0xff]  ;;  %v241_v2 = vld [vmem:[#allocation5 + $0x148] sm:$0xff] }
  0x35   :  { %v712_v62 = vpack.c.bf16 %v239_v61, %v238_v60  ;;  %v715_v3 = vpack.c.bf16 %v241_v2, %v240_v63  ;;  %v242_v4 = vld [vmem:[#allocation5 + $0x150] sm:$0xff]  ;;  %v243_v5 = vld [vmem:[#allocation5 + $0x158] sm:$0xff]  ;;  %v244_v7 = vld [vmem:[#allocation5 + $0x160] sm:$0xff] }
  0x36   :  { %v718_v6 = vpack.c.bf16 %v243_v5, %v242_v4  ;;  %v245_v8 = vld [vmem:[#allocation5 + $0x168] sm:$0xff]  ;;  %v246_v10 = vld [vmem:[#allocation5 + $0x170] sm:$0xff]  ;;  %v247_v11 = vld [vmem:[#allocation5 + $0x178] sm:$0xff] }
  0x37   :  { %v721_v9 = vpack.c.bf16 %v245_v8, %v244_v7  ;;  %v724_v12 = vpack.c.bf16 %v247_v11, %v246_v10  ;;  %v440_v13 = vld [vmem:[%s955_s2] ss:$0 sm:$0xff]  ;;  %v251_v18 = vld [vmem:[#allocation5 + $0x180] sm:$0xff]  ;;  %v252_v19 = vld [vmem:[#allocation5 + $0x188] sm:$0xff] }
  0x38   :  { %v727_v20 = vpack.c.bf16 %v252_v19, %v251_v18  ;;  %v255_v24 = vld [vmem:[#allocation5 + $0x1a0] sm:$0xff]  ;;  %v256_v25 = vld [vmem:[#allocation5 + $0x1a8] sm:$0xff]  ;;  %v261_v32 = vld [vmem:[#allocation5 + $0x1d0] sm:$0xff] }
  0x39   :  { %v733_v26 = vpack.c.bf16 %v256_v25, %v255_v24  ;;  %v259_v29 = vld [vmem:[#allocation5 + $0x1c0] sm:$0xff]  ;;  %v260_v30 = vld [vmem:[#allocation5 + $0x1c8] sm:$0xff]  ;;  %v265_v38 = vld [vmem:[#allocation5 + $0x1f0] sm:$0xff] }
  0x3a   :  { %662 = vmatpush3.bf16.xpose.msra.mxu0 %v661_v16  ;;  %v739_v31 = vpack.c.bf16 %v260_v30, %v259_v29  ;;  %v263_v35 = vld [vmem:[#allocation5 + $0x1e0] sm:$0xff]  ;;  %v264_v36 = vld [vmem:[#allocation5 + $0x1e8] sm:$0xff]  ;;  %v441_v41 = vld [vmem:[%s955_s2 + $0x1] ss:$0 sm:$0xff] }
  0x3b   :  { %663 = vmatprep.subr.bf16.mxu0 %v834_v0  ;;  %686 = vmatpush3.bf16.xpose.msra.mxu1 %v685_v21  ;;  %v253_v21 = vld [vmem:[#allocation5 + $0x190] sm:$0xff]  ;;  %v745_v37 = vpack.c.bf16 %v264_v36, %v263_v35 }
  0x3c   :  { %687 = vmatprep.subr.bf16.mxu1 %v834_v0 }
  0x42   :  { %665 = vmatpush3.bf16.xpose.msra.mxu0 %v664_v22  ;;  %v254_v22 = vld [vmem:[#allocation5 + $0x198] sm:$0xff] }
  0x43   :  { %666 = vmatprep.subr.bf16.mxu0 %v834_v0  ;;  %689 = vmatpush3.bf16.xpose.msra.mxu1 %v688_v27  ;;  %v730_v23 = vpack.c.bf16 %v254_v22, %v253_v21  ;;  %v257_v27 = vld [vmem:[#allocation5 + $0x1b0] sm:$0xff] }
  0x44   :  { %690 = vmatprep.subr.bf16.mxu1 %v834_v0 }
  0x4a   :  { %668 = vmatpush3.bf16.xpose.msra.mxu0 %v667_v28 }
  0x4b   :  { %669 = vmatprep.subr.bf16.mxu0 %v834_v0  ;;  %692 = vmatpush3.bf16.xpose.msra.mxu1 %v691_v33  ;;  %v262_v33 = vld [vmem:[#allocation5 + $0x1d8] sm:$0xff] }
  0x4c   :  { %693 = vmatprep.subr.bf16.mxu1 %v834_v0 }
  0x52   :  { %671 = vmatpush3.bf16.xpose.msra.mxu0 %v670_v34  ;;  %v742_v34 = vpack.c.bf16 %v262_v33, %v261_v32 }
  0x53   :  { %672 = vmatprep.subr.bf16.mxu0 %v834_v0  ;;  %695 = vmatpush3.bf16.xpose.msra.mxu1 %v694_v39  ;;  %v266_v39 = vld [vmem:[#allocation5 + $0x1f8] sm:$0xff] }
  0x54   :  { %696 = vmatprep.subr.bf16.mxu1 %v834_v0 }
  0x5a   :  { %674 = vmatpush3.bf16.xpose.msra.mxu0 %v673_v40  ;;  %v748_v40 = vpack.c.bf16 %v266_v39, %v265_v38 }
  0x5b   :  { %675 = vmatprep.subr.bf16.mxu0 %v834_v0  ;;  %698 = vmatpush3.bf16.xpose.msra.mxu1 %v697_v45  ;;  %v444_v45 = vld [vmem:[%s955_s2 + $0x2] ss:$0 sm:$0xff] }
  0x5c   :  { %699 = vmatprep.subr.bf16.mxu1 %v834_v0 }
  0x62   :  { %677 = vmatpush3.bf16.xpose.msra.mxu0 %v676_v46 }
  0x63   :  { %702 = vmatprep.subr.bf16.mxu0 %v834_v0  ;;  %701 = vmatpush3.bf16.xpose.msra.mxu1 %v700_v49  ;;  %v445_v49 = vld [vmem:[%s955_s2 + $0x3] ss:$0 sm:$0xff] }
  0x64   :  { %726 = vmatprep.subr.bf16.mxu1 %v834_v0 }
  0x69   :  { %547 = vmatmul.mubr.f32.vlgmr.msra.gmra.mrb[0].mxu0 %v41_v50 }
  0x6a   :  { %616 = vmatprep.mubr.msk.f32.mxu0 %vm835_vm0, %v836_v1  ;;  %704 = vmatpush3.bf16.xpose.msra.mxu0 %v703_v53 }
  0x6b   :  { %705 = vmatprep.subr.bf16.mxu0 %v834_v0 }
  0x72   :  { %707 = vmatpush3.bf16.xpose.msra.mxu0 %v706_v56 }
  0x73   :  { %708 = vmatprep.subr.bf16.mxu0 %v834_v0 }
  0x7a   :  { %710 = vmatpush3.bf16.xpose.msra.mxu0 %v709_v59 }
  0x7b   :  { %711 = vmatprep.subr.bf16.mxu0 %v834_v0 }
  0x82   :  { %713 = vmatpush3.bf16.xpose.msra.mxu0 %v712_v62 }
  0x83   :  { %714 = vmatprep.subr.bf16.mxu0 %v834_v0 }
  0x8a   :  { %716 = vmatpush3.bf16.xpose.msra.mxu0 %v715_v3 }
  0x8b   :  { %717 = vmatprep.subr.bf16.mxu0 %v834_v0 }
  0x92   :  { %719 = vmatpush3.bf16.xpose.msra.mxu0 %v718_v6 }
  0x93   :  { %720 = vmatprep.subr.bf16.mxu0 %v834_v0 }
  0x9a   :  { %722 = vmatpush3.bf16.xpose.msra.mxu0 %v721_v9 }
  0x9b   :  { %723 = vmatprep.subr.bf16.mxu0 %v834_v0 }
  0xa2   :  { %725 = vmatpush3.bf16.xpose.msra.mxu0 %v724_v12 }
 0x13c   :  { %v150_v14 = vpop.f32.mrb[0].mxu0 }
 0x13d   :  { %v151_v15 = vadd.f32 %v440_v13, %v150_v14  ;;  %v548_v16 = vpop.f32.mrb[1].mxu0 }
 0x13f   :  { %v154_v17 = vmax.f32 %v151_v15, 0.0 }
 0x141   :  { %582 = vmatmul.mubr.f32.vlgmr.msra.gmra.mrb[0].mxu1 %v154_v17 }
 0x142   :  { %651 = vmatprep.mubr.msk.f32.mxu1 %vm835_vm0, %v836_v1  ;;  %728 = vmatpush3.bf16.xpose.msra.mxu1 %v727_v20  ;;  %v258_v1 = vld [vmem:[#allocation5 + $0x1b8] sm:$0xff] }
 0x143   :  { %729 = vmatprep.subr.bf16.mxu1 %v834_v0  ;;  %v736_v28 = vpack.c.bf16 %v258_v1, %v257_v27 }
 0x14a   :  { %731 = vmatpush3.bf16.xpose.msra.mxu1 %v730_v23 }
 0x14b   :  { %732 = vmatprep.subr.bf16.mxu1 %v834_v0 }
 0x152   :  { %734 = vmatpush3.bf16.xpose.msra.mxu1 %v733_v26 }
 0x153   :  { %735 = vmatprep.subr.bf16.mxu1 %v834_v0 }
 0x15a   :  { %737 = vmatpush3.bf16.xpose.msra.mxu1 %v736_v28 }
 0x15b   :  { %738 = vmatprep.subr.bf16.mxu1 %v834_v0 }
 0x162   :  { %740 = vmatpush3.bf16.xpose.msra.mxu1 %v739_v31 }
 0x163   :  { %741 = vmatprep.subr.bf16.mxu1 %v834_v0 }
 0x16a   :  { %743 = vmatpush3.bf16.xpose.msra.mxu1 %v742_v34 }
 0x16b   :  { %744 = vmatprep.subr.bf16.mxu1 %v834_v0 }
 0x172   :  { %746 = vmatpush3.bf16.xpose.msra.mxu1 %v745_v37 }
 0x173   :  { %747 = vmatprep.subr.bf16.mxu1 %v834_v0 }
 0x17a   :  { %749 = vmatpush3.bf16.xpose.msra.mxu1 %v748_v40 }
 0x214   :  { %v227_v42 = vpop.f32.mrb[0].mxu1 }
 0x215   :  { %v228_v43 = vadd.f32 %v441_v41, %v227_v42  ;;  %v583_v44 = vpop.f32.mrb[1].mxu1 }
 0x217   :  { %617 = vmatmul.mubr.f32.vlgmr.msra.gmra.mrb[2].mxu0 %v228_v43 }
 0x2ea   :  { %v341_v46 = vpop.f32.mrb[2].mxu0 }
 0x2eb   :  { %v342_v47 = vadd.f32 %v444_v45, %v341_v46  ;;  %v618_v48 = vpop.f32.mrb[3].mxu0 }
 0x2ed   :  { %v345_v0 = vmax.f32 %v342_v47, 0.0 }
 0x2ef   :  { %652 = vmatmul.mubr.f32.vlgmr.msra.gmra.mrb[2].mxu1 %v345_v0 }
 0x3c2   :  { %v418_v50 = vpop.f32.mrb[2].mxu1 }
 0x3c3   :  { %v419_v51 = vadd.f32 %v445_v49, %v418_v50  ;;  %v653_v52 = vpop.f32.mrb[3].mxu1 }
 0x3c5   :  { %422 = vst [vmem:[#allocation7] sm:$0xff] %v419_v51 }
 0x3c6   :  { %813 = shalt.err (!%p810_p6)
}
 0x3c7   :  { %s814_s22 = scalar_lea.hbm %s956_s3, 128 }
 0x3c8   :  { %p815_p7 = scmp.ne.s32.totalorder %s956_s3, %s814_s22  ;;  %p818_p8 = scmp.lt.u32.totalorder %s814_s22, %s956_s3 }
 0x3ca   :  { %p820_p9 = pnand %p818_p8, %p815_p7 }
 0x3cc   :  { %823 = shalt.err (!%p820_p9)
}
 0x3cd   :  { %432 = dma.vmem_to_hbm [thread:$0]  %s430_s18, 128, %s956_s3, [#allocation4]  }
 0x3ce   :  { %828 = dma.done.wait [#allocation4], 128  }
 0x3cf   :  { %829 = vsyncadd [#allocation4], 4294967168 }
 0x3d0   :  { %436 = vsyncpa [#allocation3], 1 }
 0x3d1   :  { %437 = vsyncpa [#allocation6], 1 }
 0x3d2   :  { %438 = vsyncpa [#allocation4], 1 }

</bundles_post_ra>
